<compile_context>
chip_gen: v5e
topology: v5e:2x2
jax: 0.10.0
libtpu: 0.0.40
codegen_flags: <defaults>
</compile_context>

<pallas_src>
import functools

import jax
import jax.numpy as jnp
from jax.experimental import pallas as pl
from jax.experimental.pallas import tpu as pltpu


def _round_up(x, m):
    return ((x + m - 1) // m) * m


def _combine_kernel(x_ref, w1_ref, b1_ref, w2_ref, b2_ref, w3_ref, b3_ref,
                    o_ref, *, out_dim):
    # Layer 1: Linear (f32, MXU accumulate in f32) + bias + ReLU.
    h = jnp.dot(x_ref[...], w1_ref[...], preferred_element_type=jnp.float32)
    h = jnp.maximum(h + b1_ref[...], 0.0)
    # Layer 2: Linear + ReLU.
    h = jnp.dot(h, w2_ref[...], preferred_element_type=jnp.float32)
    h = jnp.maximum(h + b2_ref[...], 0.0)
    # Output layer on 128-lane-padded weights; padded columns carry a -inf
    # bias, so exp() of them is exactly 0 and the softmax over the real
    # num_methods columns is exact.
    # NOTE: on a partial final batch tile the softmax runs over garbage rows
    # (possibly producing NaN there); those rows are discarded by the bounded
    # output store, so this is benign.
    logits = jnp.dot(h, w3_ref[...], preferred_element_type=jnp.float32) + b3_ref[...]
    m = jnp.max(logits, axis=-1, keepdims=True)
    e = jnp.exp(logits - m)
    probs = e / jnp.sum(e, axis=-1, keepdims=True)  # exact normalization (free here)
    # Store only the real methods: the lane-masked store is much cheaper than
    # writing a padded (B, 128) array and slicing it in a separate XLA pass.
    o_ref[...] = probs[:, :out_dim].astype(o_ref.dtype)


def prepare_params(params):
    """One-time parameter prep (hoisted out of the forward so it isn't redone
    per call): pad the output layer to a multiple of 128 lanes (zero weight
    columns, -inf bias) and reshape biases to (1, n) rows."""
    (w1, b1), (w2, b2), (w3, b3) = params
    h2, out_dim = w3.shape
    out_pad = _round_up(out_dim, 128)
    w3_p = jnp.zeros((h2, out_pad), jnp.float32).at[:, :out_dim].set(
        w3.astype(jnp.float32))
    b3_p = jnp.full((out_pad,), -jnp.inf, jnp.float32).at[:out_dim].set(
        b3.astype(jnp.float32))
    return dict(
        w1=w1.astype(jnp.float32),
        b1=b1.astype(jnp.float32).reshape(1, -1),
        w2=w2.astype(jnp.float32),
        b2=b2.astype(jnp.float32).reshape(1, -1),
        w3=w3_p,
        b3=b3_p.reshape(1, -1),
        out_dim=out_dim,
        out_pad=out_pad,
    )


def combine_model_forward(x, prepared, *, tile_b=4096):
    """x: (B, 2*num_models) float32 -> (B, num_methods) softmax probabilities."""
    w1, b1 = prepared["w1"], prepared["b1"]
    w2, b2 = prepared["w2"], prepared["b2"]
    w3, b3 = prepared["w3"], prepared["b3"]
    out_dim, out_pad = prepared["out_dim"], prepared["out_pad"]

    B, in_dim = x.shape
    h1 = w1.shape[1]
    h2 = w2.shape[1]

    # Batch tile: as large as practical (per-grid-step overhead ~0.35 us), but
    # for big batches prefer >= 2 grid blocks so both v7x TensorCores get work
    # under dimension_semantics=("parallel",). No effect on v5e/v6e (1 TC).
    tb = min(tile_b, _round_up(B, 8))
    half = _round_up(pl.cdiv(B, 2), 8)
    if B >= 2048 and half < tb:
        tb = half
    n_blocks = pl.cdiv(B, tb)

    def const_spec(shape):
        # Weights/biases: constant index_map -> VMEM-resident across grid steps.
        return pl.BlockSpec(shape, lambda i: (0,) * len(shape))

    # Advisory cost estimate; byte counts use lane-padded physical row widths.
    flops = 2 * B * (in_dim * h1 + h1 * h2 + h2 * out_pad)
    bytes_accessed = (B * _round_up(in_dim, 128) * 4          # x (f32, padded row)
                      + B * _round_up(out_dim, 128) * 4       # output (f32, padded row)
                      + (in_dim * h1 + h1 * h2 + h2 * out_pad) * 4
                      + (h1 + h2 + out_pad) * 4)
    transcendentals = B * out_pad                              # exp per padded logit

    kernel = functools.partial(_combine_kernel, out_dim=out_dim)

    return pl.pallas_call(
        kernel,
        out_shape=jax.ShapeDtypeStruct((B, out_dim), jnp.float32),
        grid=(n_blocks,),
        in_specs=[
            pl.BlockSpec((tb, in_dim), lambda i: (i, 0)),
            const_spec((in_dim, h1)), const_spec((1, h1)),
            const_spec((h1, h2)), const_spec((1, h2)),
            const_spec((h2, out_pad)), const_spec((1, out_pad)),
        ],
        out_specs=pl.BlockSpec((tb, out_dim), lambda i: (i, 0)),
        compiler_params=pltpu.CompilerParams(
            dimension_semantics=("parallel",),
            vmem_limit_bytes=32 * 1024 * 1024),  # covers v5e's 16 MiB default
        cost_estimate=pl.CostEstimate(
            flops=flops,
            transcendentals=transcendentals,
            bytes_accessed=bytes_accessed),
    )(x, w1, b1, w2, b2, w3, b3)


def init_params(key, num_models, num_methods, hidden_sizes):
    """Deterministic Kaiming-uniform-like init (matches nn.Linear shapes)."""
    layer_sizes = [2 * num_models] + list(hidden_sizes) + [num_methods]
    params = []
    for i in range(len(layer_sizes) - 1):
        fan_in, fan_out = layer_sizes[i], layer_sizes[i + 1]
        key, kw, kb = jax.random.split(key, 3)
        bound = 1.0 / jnp.sqrt(fan_in)
        # Stored as (in, out): transpose of PyTorch's (out, in) nn.Linear weight.
        w = jax.random.uniform(kw, (fan_in, fan_out), jnp.float32, -bound, bound)
        b = jax.random.uniform(kb, (fan_out,), jnp.float32, -bound, bound)
        params.append((w, b))
    return params


def reference_forward(x, params):
    h = x
    for (w, b) in params[:-1]:
        h = jnp.maximum(h @ w + b, 0.0)
    w, b = params[-1]
    return jax.nn.softmax(h @ w + b, axis=-1)


if __name__ == "__main__":
    # Small shapes consistent with the module.
    num_models = 4          # input dim = 2 * num_models = 8
    num_methods = 5
    hidden_sizes = [32, 16]
    batch = 2

    key = jax.random.PRNGKey(0)
    key, kx = jax.random.split(key)
    x = jax.random.normal(kx, (batch, 2 * num_models), jnp.float32)
    params = init_params(key, num_models, num_methods, hidden_sizes)
    prepared = prepare_params(params)

    out = combine_model_forward(x, prepared)
    out = jax.block_until_ready(out)

    ref = reference_forward(x, params)
    assert out.shape == (batch, num_methods)
    # Full f32 path + exact softmax division -> tight parity with the reference.
    assert jnp.allclose(out, ref, atol=1e-5, rtol=1e-5), (out, ref)
    assert jnp.allclose(jnp.sum(out, axis=-1), 1.0, atol=1e-5)

    print("KERNEL_OK")
</pallas_src>

<mosaic_0001>
module attributes {stable_mosaic.version = 11 : i64} {
  func.func @_combine_kernel(%arg0: i32, %arg1: memref<8x8xf32, #tpu.memory_space<vmem>>, %arg2: memref<8x32xf32, #tpu.memory_space<vmem>>, %arg3: memref<1x32xf32, #tpu.memory_space<vmem>>, %arg4: memref<32x16xf32, #tpu.memory_space<vmem>>, %arg5: memref<1x16xf32, #tpu.memory_space<vmem>>, %arg6: memref<16x128xf32, #tpu.memory_space<vmem>>, %arg7: memref<1x128xf32, #tpu.memory_space<vmem>>, %arg8: memref<8x5xf32, #tpu.memory_space<vmem>>) attributes {dimension_semantics = [#tpu.dimension_semantics<parallel>], iteration_bounds = array<i64: 1>, scalar_prefetch = 0 : i64, scratch_operands = 0 : i64, tpu.core_type = #tpu.core_type<tc>, window_params = [{transform_indices = @transform_0, window_bounds = array<i64: 8, 8>}, {pipeline_mode = #tpu.pipeline_mode<synchronous>, transform_indices = @transform_1, window_bounds = array<i64: 8, 32>}, {pipeline_mode = #tpu.pipeline_mode<synchronous>, transform_indices = @transform_2, window_bounds = array<i64: 1, 32>}, {pipeline_mode = #tpu.pipeline_mode<synchronous>, transform_indices = @transform_3, window_bounds = array<i64: 32, 16>}, {pipeline_mode = #tpu.pipeline_mode<synchronous>, transform_indices = @transform_4, window_bounds = array<i64: 1, 16>}, {pipeline_mode = #tpu.pipeline_mode<synchronous>, transform_indices = @transform_5, window_bounds = array<i64: 16, 128>}, {pipeline_mode = #tpu.pipeline_mode<synchronous>, transform_indices = @transform_6, window_bounds = array<i64: 1, 128>}, {transform_indices = @transform_7, window_bounds = array<i64: 8, 5>}]} {
    %c0 = arith.constant 0 : index
    %c0_0 = arith.constant 0 : index
    %0 = vector.load %arg1[%c0, %c0_0] : memref<8x8xf32, #tpu.memory_space<vmem>>, vector<8x8xf32>
    %c0_1 = arith.constant 0 : index
    %c0_2 = arith.constant 0 : index
    %1 = vector.load %arg2[%c0_1, %c0_2] : memref<8x32xf32, #tpu.memory_space<vmem>>, vector<8x32xf32>
    %cst = arith.constant dense<0.000000e+00> : vector<8x32xf32>
    %2 = tpu.matmul %0, %1, %cst {dimension_numbers = #tpu.dot_dimension_numbers<[1], [0], [0], [1], [0, 0, 1, 1], [], []>} : vector<8x8xf32>, vector<8x32xf32>, vector<8x32xf32> -> vector<8x32xf32>
    %c0_3 = arith.constant 0 : index
    %c0_4 = arith.constant 0 : index
    %3 = vector.load %arg3[%c0_3, %c0_4] : memref<1x32xf32, #tpu.memory_space<vmem>>, vector<1x32xf32>
    %4 = vector.broadcast %3 : vector<1x32xf32> to vector<8x32xf32>
    %5 = arith.addf %2, %4 : vector<8x32xf32>
    %cst_5 = arith.constant 0.000000e+00 : f32
    %6 = vector.broadcast %cst_5 : f32 to vector<8x32xf32>
    %7 = arith.maximumf %5, %6 : vector<8x32xf32>
    %c0_6 = arith.constant 0 : index
    %c0_7 = arith.constant 0 : index
    %8 = vector.load %arg4[%c0_6, %c0_7] : memref<32x16xf32, #tpu.memory_space<vmem>>, vector<32x16xf32>
    %cst_8 = arith.constant dense<0.000000e+00> : vector<8x16xf32>
    %9 = tpu.matmul %7, %8, %cst_8 {dimension_numbers = #tpu.dot_dimension_numbers<[1], [0], [0], [1], [0, 0, 1, 1], [], []>} : vector<8x32xf32>, vector<32x16xf32>, vector<8x16xf32> -> vector<8x16xf32>
    %c0_9 = arith.constant 0 : index
    %c0_10 = arith.constant 0 : index
    %10 = vector.load %arg5[%c0_9, %c0_10] : memref<1x16xf32, #tpu.memory_space<vmem>>, vector<1x16xf32>
    %11 = vector.broadcast %10 : vector<1x16xf32> to vector<8x16xf32>
    %12 = arith.addf %9, %11 : vector<8x16xf32>
    %cst_11 = arith.constant 0.000000e+00 : f32
    %13 = vector.broadcast %cst_11 : f32 to vector<8x16xf32>
    %14 = arith.maximumf %12, %13 : vector<8x16xf32>
    %c0_12 = arith.constant 0 : index
    %c0_13 = arith.constant 0 : index
    %15 = vector.load %arg6[%c0_12, %c0_13] : memref<16x128xf32, #tpu.memory_space<vmem>>, vector<16x128xf32>
    %cst_14 = arith.constant dense<0.000000e+00> : vector<8x128xf32>
    %16 = tpu.matmul %14, %15, %cst_14 {dimension_numbers = #tpu.dot_dimension_numbers<[1], [0], [0], [1], [0, 0, 1, 1], [], []>} : vector<8x16xf32>, vector<16x128xf32>, vector<8x128xf32> -> vector<8x128xf32>
    %c0_15 = arith.constant 0 : index
    %c0_16 = arith.constant 0 : index
    %17 = vector.load %arg7[%c0_15, %c0_16] : memref<1x128xf32, #tpu.memory_space<vmem>>, vector<1x128xf32>
    %18 = vector.broadcast %17 : vector<1x128xf32> to vector<8x128xf32>
    %19 = arith.addf %16, %18 : vector<8x128xf32>
    %cst_17 = arith.constant dense<0xFF800000> : vector<8xf32>
    %20 = vector.multi_reduction <maximumf>, %19, %cst_17 [1] : vector<8x128xf32> to vector<8xf32>
    %21 = vector.shape_cast %20 : vector<8xf32> to vector<8x1xf32>
    %22 = vector.broadcast %21 : vector<8x1xf32> to vector<8x128xf32>
    %23 = arith.subf %19, %22 : vector<8x128xf32>
    %24 = math.exp %23 : vector<8x128xf32>
    %cst_18 = arith.constant dense<0.000000e+00> : vector<8xf32>
    %25 = vector.multi_reduction <add>, %24, %cst_18 [1] : vector<8x128xf32> to vector<8xf32>
    %26 = vector.shape_cast %25 : vector<8xf32> to vector<8x1xf32>
    %27 = vector.broadcast %26 : vector<8x1xf32> to vector<8x128xf32>
    %28 = arith.divf %24, %27 : vector<8x128xf32>
    %29 = vector.extract_strided_slice %28 {offsets = [0, 0], sizes = [8, 5], strides = [1, 1]} : vector<8x128xf32> to vector<8x5xf32>
    %c0_19 = arith.constant 0 : index
    %c0_20 = arith.constant 0 : index
    %30 = vector.load %arg8[%c0_19, %c0_20] : memref<8x5xf32, #tpu.memory_space<vmem>>, vector<8x5xf32>
    tpu.vector_store %arg8[%c0_19, %c0_20], %29 {strides = array<i32>} : memref<8x5xf32, #tpu.memory_space<vmem>>, vector<8x5xf32>,
    return
  }
  func.func @transform_0(%arg0: i32) -> (i32, i32) {
    %c0_i32 = arith.constant 0 : i32
    %c0_i32_0 = arith.constant 0 : i32
    return %arg0, %c0_i32 : i32, i32
  }
  func.func @transform_1(%arg0: i32) -> (i32, i32) {
    %c0_i32 = arith.constant 0 : i32
    %c0_i32_0 = arith.constant 0 : i32
    %c0_i32_1 = arith.constant 0 : i32
    return %c0_i32, %c0_i32_0 : i32, i32
  }
  func.func @transform_2(%arg0: i32) -> (i32, i32) {
    %c0_i32 = arith.constant 0 : i32
    %c0_i32_0 = arith.constant 0 : i32
    %c0_i32_1 = arith.constant 0 : i32
    return %c0_i32, %c0_i32_0 : i32, i32
  }
  func.func @transform_3(%arg0: i32) -> (i32, i32) {
    %c0_i32 = arith.constant 0 : i32
    %c0_i32_0 = arith.constant 0 : i32
    %c0_i32_1 = arith.constant 0 : i32
    return %c0_i32, %c0_i32_0 : i32, i32
  }
  func.func @transform_4(%arg0: i32) -> (i32, i32) {
    %c0_i32 = arith.constant 0 : i32
    %c0_i32_0 = arith.constant 0 : i32
    %c0_i32_1 = arith.constant 0 : i32
    return %c0_i32, %c0_i32_0 : i32, i32
  }
  func.func @transform_5(%arg0: i32) -> (i32, i32) {
    %c0_i32 = arith.constant 0 : i32
    %c0_i32_0 = arith.constant 0 : i32
    %c0_i32_1 = arith.constant 0 : i32
    return %c0_i32, %c0_i32_0 : i32, i32
  }
  func.func @transform_6(%arg0: i32) -> (i32, i32) {
    %c0_i32 = arith.constant 0 : i32
    %c0_i32_0 = arith.constant 0 : i32
    %c0_i32_1 = arith.constant 0 : i32
    return %c0_i32, %c0_i32_0 : i32, i32
  }
  func.func @transform_7(%arg0: i32) -> (i32, i32) {
    %c0_i32 = arith.constant 0 : i32
    %c0_i32_0 = arith.constant 0 : i32
    return %arg0, %c0_i32 : i32, i32
  }
}

</mosaic_0001>

<bundles_post_ra>
// kernel: tpu_custom_call.1
= control target key start
LH: loop header
LB: loop body
LE: loop exit
PB: predicated region body
PF: predicated region fallthrough
CT: control target
= control target key end

     0   :  { %12 = vsyncpa [#allocation3], 0  ;;  %vm33_vm0 = vcmask 64512   ;;  %vm66_vm1 = vcmask 261120   ;;  %vm97_vm2 = vcmask 130048   ;;  %vm143_vm7 = vcmask 39936   ;;  %s281_s0 = inlined_call_operand.vmem [shape: f32[2,8], index: 0, kind: input, shape index: {}]   ;;  %s282_s1 = inlined_call_operand.vmem [shape: f32[8,32], index: 1, kind: input, shape index: {}]   ;;  %s283_s2 = inlined_call_operand.vmem [shape: f32[1,32], index: 2, kind: input, shape index: {}]   ;;  %s284_s3 = inlined_call_operand.vmem [shape: f32[32,16], index: 3, kind: input, shape index: {}]   ;;  %s285_s4 = inlined_call_operand.vmem [shape: f32[1,16], index: 4, kind: input, shape index: {}]   ;;  %s286_s5 = inlined_call_operand.vmem [shape: f32[16,128], index: 5, kind: input, shape index: {}]   ;;  %s287_s6 = inlined_call_operand.vmem [shape: f32[1,128], index: 6, kind: input, shape index: {}]   ;;  %s288_s7 = inlined_call_operand.hbm [shape: f32[2,5], index: 7, kind: output, shape index: {}]  }
   0x1   :  { %v28_v0 = vld [vmem:[%s282_s1] sm:$0xff]  ;;  %v61_v2 = vld [vmem:[%s284_s3 + $0x18] sm:$0xff]  ;;  %v60_v3 = vld [vmem:[%s284_s3 + $0x10] sm:$0xff] }
   0x2   :  { %v27_v1 = vld [vmem:[%s281_s0] sm:$0xff]  ;;  %52 = vmatpush.msra.mxu0 %v28_v0  ;;  %82 = vmatpush.msra.mxu1 %v61_v2  ;;  %v59_v4 = vld [vmem:[%s284_s3 + $0x8] sm:$0xff] }
   0x3   :  { %163 = vmatmul.msk.f32.vlgmr.msra.gmra.mxu0 %vm33_vm0, %v27_v1  ;;  %v58_v5 = vld [vmem:[%s284_s3] sm:$0xff]  ;;  %v92_v10 = vld [vmem:[%s286_s5 + $0x8] sm:$0xff] }
   0x4   :  { %83 = vmatpush.msra.mxu1 %v60_v3  ;;  %v169_v6 = vld [vmem:[%s283_s2] ss:$0 sm:$0xff]  ;;  %115 = vmatpush.msra.mxu2 %v92_v10 }
   0x5   :  { %v91_v11 = vld [vmem:[%s286_s5] sm:$0xff] }
   0x6   :  { %84 = vmatpush.msra.mxu1 %v59_v4  ;;  %116 = vmatpush.msra.mxu2 %v91_v11  ;;  %v170_v12 = vld [vmem:[%s285_s4] ss:$0 sm:$0xff] }
   0x7   :  { %v171_v16 = vld [vmem:[%s287_s6] ss:$0 sm:$0xff] }
   0x8   :  { %85 = vmatpush.msra.mxu1 %v58_v5 }
  0x80   :  { %v54_v7 = vpop.f32.mrf.mxu0 }
  0x81   :  { %v55_v8 = vadd.f32 %v169_v6, %v54_v7 }
  0x83   :  { %v57_v9 = vmax.f32 %v55_v8, 0.0 }
  0x85   :  { %164 = vmatmul.msk.f32.vlgmr.msra.gmra.mxu1 %vm66_vm1, %v57_v9 }
 0x102   :  { %v87_v13 = vpop.f32.mrf.mxu1 }
 0x103   :  { %v88_v14 = vadd.f32 %v170_v12, %v87_v13 }
 0x105   :  { %v90_v15 = vmax.f32 %v88_v14, 0.0 }
 0x107   :  { %165 = vmatmul.msk.f32.vlgmr.msra.gmra.mxu2 %vm97_vm2, %v90_v15 }
 0x18a   :  { %v118_v17 = vpop.f32.mrf.mxu2 }
 0x18b   :  { %v119_v18 = vadd.f32 %v171_v16, %v118_v17 }
 0x18d   :  { %121 = vmax.xlane.f32.xlu0 %v119_v18 }
 0x200   :  { %v122_v19 = vpop.xlane.xlu0 %121 }
 0x201   :  { %v123_v20 = vsub.f32 %v119_v18, %v122_v19 }
 0x203   :  { %v124_v21 = vmul.f32 1.442695, %v123_v20 }
 0x205   :  { %172 = vpow2.f32 %v124_v21 }
 0x20b   :  { %v173_v22 = vpop.eup %172 }
 0x20c   :  { %126 = vadd.xlane.f32.xlu0 %v173_v22 }
 0x27f   :  { %v127_v23 = vpop.xlane.xlu0 %126 }
 0x280   :  { %174 = vrcp.f32 %v127_v23  ;;  %v139_v27 = vand.u32 2147483648, %v127_v23  ;;  %v137_v29 = vand.u32 2147483647, %v127_v23  ;;  %vm133_vm4 = vweird.f32 %v127_v23 }
 0x282   :  { %v140_v31 = vor.u32 1.1754944e-38, %v139_v27  ;;  %vm138_vm6 = vcmp.eq.f32.partialorder %v137_v29, 8.507059e+37 }
 0x286   :  { %v175_v24 = vpop.eup %174 }
 0x287   :  { %v129_v25 = vmul.f32 %v175_v24, %v127_v23  ;;  %vm134_vm3 = vweird.f32 %v175_v24 }
 0x288   :  { %vm135_vm5 = vmor %vm133_vm4, %vm134_vm3 }
 0x289   :  { %v130_v26 = vsub.f32 1.0, %v129_v25 }
 0x28b   :  { %v131_v28 = vmul.f32 %v175_v24, %v130_v26 }
 0x28d   :  { %v132_v30 = vadd.f32 %v175_v24, %v131_v28 }
 0x28f   :  { %v136_v32 = vsel %vm135_vm5, %v175_v24, %v132_v30 }
 0x290   :  { %v141_v33 = vsel %vm138_vm6, %v140_v31, %v136_v32 }
 0x291   :  { %v142_v34 = vmul.f32 %v173_v22, %v141_v33 }
 0x293   :  { %144 = vst.msk [vmem:[#allocation2] sm:$0xff] %vm143_vm7, %v142_v34 }
 0x294   :  { %148 = vsyncadd [#allocation3], 96  ;;  %s151_s6 = sshll.u32 %s288_s7, 4  ;;  %s202_s19 = smov [#allocation2]   ;;  %s152_s6 = int_to_ptr.hbm [resolvable:$true] %s151_s6 }
 0x295   :  { %s149_s20 = sshll.u32 %s202_s19, 4  ;;  %s203_s21 = smov 32   ;;  %s150_s20 = int_to_ptr.vmem [resolvable:$true] %s149_s20 }
 0x296   :  { %s204_s22 = smov 2  }
 0x297   :  { %157 = dma.vmem_to_hbm [thread:$0]  %s150_s20, 32, %s152_s6, [#allocation3], %s203_s21, %s203_s21, %s204_s22  }
 0x298   :  { %200 = dma.done.wait [#allocation3], 128  }
 0x299   :  { %201 = vsyncadd [#allocation3], 4294967168 }
 0x29a   :  { %162 = vsyncpa [#allocation3], 1 }

</bundles_post_ra>
